<compile_context>
chip_gen: v7x
topology: tpu7x:2x2x1
jax: 0.10.0
libtpu: 0.0.40
codegen_flags: <defaults>
</compile_context>

<pallas_src>
import jax
import jax.numpy as jnp
from jax.experimental import pallas as pl
from jax.experimental.pallas import tpu as pltpu


def _round_up(x, m):
    return ((x + m - 1) // m) * m


def _vmem_capacity_bytes():
    try:
        return int(pltpu.get_tpu_info().vmem_capacity_bytes)
    except Exception:
        return 64 << 20  # v7x per-TensorCore size: a safe floor for all generations


def _pick_ff_block(d_ff_p, per_col_bytes, budget):
    """Largest d_ff block (multiple of 128 dividing d_ff_p) whose W1+W2 blocks fit
    `budget` (1 buffer when fully resident, 2 buffers once blocked/streamed)."""
    q = d_ff_p // 128
    for n in range(1, q + 1):
        if q % n:
            continue
        tf = d_ff_p // n
        nbuf = 1 if n == 1 else 2
        if nbuf * tf * per_col_bytes <= budget:
            return tf
    return 128


def ffn_kernel(x_ref, w1_ref, b1_ref, w2_ref, b2_ref, o_ref, acc_ref):
    k = pl.program_id(1)

    @pl.when(k == 0)
    def _():
        acc_ref[...] = jnp.zeros_like(acc_ref)

    # First linear (this d_ff block): bf16 operands, f32 accumulation on the MXU.
    x_bf = x_ref[...].astype(w1_ref.dtype)            # in-kernel cast (VPU, hidden under MXU)
    h = jnp.dot(x_bf, w1_ref[...], preferred_element_type=jnp.float32)
    h = jnp.maximum(h + b1_ref[...], 0.0)             # bias + ReLU
    # dropout = identity (eval mode)
    # TODO(synk): training-mode stochastic dropout via pltpu.prng_seed / prng_random_bits.

    # Second linear: accumulate this d_ff block's contribution in f32.
    acc_ref[...] += jnp.dot(h.astype(w2_ref.dtype), w2_ref[...],
                            preferred_element_type=jnp.float32)

    @pl.when(k == pl.num_programs(1) - 1)
    def _():
        o_ref[...] = (acc_ref[...] + b2_ref[...]).astype(o_ref.dtype)


def _spec(shape, index_map, mode=None):
    if mode is None:
        return pl.BlockSpec(shape, index_map)
    return pl.BlockSpec(shape, index_map, pipeline_mode=mode)


def _ffn_call(x2d, w1_p, b1_p, w2_p, b2_p, *, out_dtype, tm, tf,
              single_buffer_resident, vmem_limit):
    M, d_model = x2d.shape
    d_ff_p = w1_p.shape[1]
    n_m = pl.cdiv(M, tm)
    n_ff = d_ff_p // tf

    resident = pl.Buffered(1) if single_buffer_resident else None
    # When d_ff is blocked the weight blocks stream along k -> keep double buffering.
    w_mode = resident if n_ff == 1 else None

    grid_spec = pltpu.PrefetchScalarGridSpec(
        num_scalar_prefetch=0,
        grid=(n_m, n_ff),
        in_specs=[
            _spec((tm, d_model), lambda i, k: (i, 0)),           # x tile (unpadded)
            _spec((d_model, tf), lambda i, k: (0, k), w_mode),   # W1 block
            _spec((1, tf), lambda i, k: (0, k), w_mode),         # b1 block
            _spec((tf, d_model), lambda i, k: (k, 0), w_mode),   # W2 block
            _spec((1, d_model), lambda i, k: (0, 0), resident),  # b2
        ],
        out_specs=_spec((tm, d_model), lambda i, k: (i, 0)),
        scratch_shapes=[pltpu.VMEM((tm, d_model), jnp.float32)],  # f32 accumulator
    )
    return pl.pallas_call(
        ffn_kernel,
        out_shape=jax.ShapeDtypeStruct((M, d_model), out_dtype),
        grid_spec=grid_spec,
        compiler_params=pltpu.CompilerParams(
            dimension_semantics=("parallel", "arbitrary"),
            vmem_limit_bytes=vmem_limit,
        ),
    )(x2d, w1_p, b1_p, w2_p, b2_p)


def prepare_params(w1, b1, w2, b2, *, compute_dtype=jnp.bfloat16):
    """One-time weight prep: pad d_ff to a multiple of 128 (zero cols/rows are exact
    no-ops through relu + matmul) and pre-cast to the MXU dtype.  Hoisted out of the
    forward pass so the pad/cast never costs an HBM pass per call."""
    d_model, d_ff = w1.shape
    assert w2.shape == (d_ff, d_model)
    d_ff_p = _round_up(d_ff, 128)
    w1_p = (jnp.zeros((d_model, d_ff_p), compute_dtype)
            .at[:, :d_ff].set(w1.astype(compute_dtype)))
    b1_p = jnp.zeros((1, d_ff_p), jnp.float32).at[0, :d_ff].set(b1.astype(jnp.float32))
    w2_p = (jnp.zeros((d_ff_p, d_model), compute_dtype)
            .at[:d_ff, :].set(w2.astype(compute_dtype)))
    b2_p = b2.astype(jnp.float32).reshape(1, d_model)
    return w1_p, b1_p, w2_p, b2_p


def feed_forward(x, params, *, tm=512, ff_block=None, out_dtype=None):
    """x: [batch, seq, d_model] -> [batch, seq, d_model] (eval-mode FFN)."""
    w1_p, b1_p, w2_p, b2_p = params
    batch, seq, d_model = x.shape
    d_ff_p = w1_p.shape[1]
    assert w1_p.shape[0] == d_model and w2_p.shape == (d_ff_p, d_model)
    out_dtype = x.dtype if out_dtype is None else out_dtype

    M = batch * seq
    x2d = x.reshape(M, d_model)

    vmem_cap = _vmem_capacity_bytes()
    bytes_cd = jnp.dtype(w1_p.dtype).itemsize
    lane_dm = _round_up(d_model, 128)   # VMEM lane padding of the d_model axis
    sub_dm = _round_up(d_model, 8)

    # d_ff block: full d_ff if the single-buffered weights fit the budget,
    # else the largest 128-multiple divisor that fits double-buffered.
    per_col_bytes = (sub_dm + lane_dm) * bytes_cd
    weight_budget = max(vmem_cap // 3, 8 << 20)
    if ff_block is not None:
        tf = min(d_ff_p, _round_up(ff_block, 128))
        if d_ff_p % tf != 0:
            tf = _pick_ff_block(d_ff_p, per_col_bytes, weight_budget)
    else:
        tf = _pick_ff_block(d_ff_p, per_col_bytes, weight_budget)
    n_ff = d_ff_p // tf

    # Row tile: large by default, shrink so (a) there are >=2 row tiles for the
    # v7x megacore split and (b) the clipped tail tile wastes < 25% of the rows.
    tm = max(8, min(_round_up(tm, 8), _round_up(M, 8)))
    while tm > 8 and (pl.cdiv(M, tm) < 2 or (pl.cdiv(M, tm) * tm - M) * 4 > M):
        tm = max(8, _round_up(tm // 2, 8))

    # Explicit VMEM budget: double-buffered x/out tiles, weight blocks (1 buffer
    # when resident), biases, f32 accumulator, and the h intermediate Mosaic
    # materializes (f32 + bf16 copy).  Capped at the device's physical VMEM.
    bytes_x = jnp.dtype(x.dtype).itemsize
    bytes_o = jnp.dtype(out_dtype).itemsize
    nbuf_w = 1 if n_ff == 1 else 2
    vmem_est = (
        2 * tm * lane_dm * bytes_x
        + 2 * tm * lane_dm * bytes_o
        + nbuf_w * tf * (sub_dm + lane_dm) * bytes_cd
        + 2 * (tf + lane_dm) * 4
        + tm * lane_dm * 4
        + tm * tf * (4 + bytes_cd)
    )
    vmem_limit = int(min(vmem_est + (8 << 20), vmem_cap))

    kwargs = dict(out_dtype=out_dtype, tm=tm, tf=tf, vmem_limit=vmem_limit)
    try:
        out2d = _ffn_call(x2d, w1_p, b1_p, w2_p, b2_p,
                          single_buffer_resident=True, **kwargs)
    except Exception:
        # pipeline_mode / pl.Buffered(1) unsupported here -> default buffering.
        out2d = _ffn_call(x2d, w1_p, b1_p, w2_p, b2_p,
                          single_buffer_resident=False, **kwargs)
    return out2d.reshape(batch, seq, d_model)


def init_params(key, d_model, d_ff):
    """Deterministic init mimicking nn.Linear's uniform(-1/sqrt(fan_in), +).
    Weights are stored [in, out] (transposed vs. PyTorch) so we compute x @ W."""
    k1, k2, k3, k4 = jax.random.split(key, 4)
    lim1 = 1.0 / (d_model ** 0.5)
    lim2 = 1.0 / (d_ff ** 0.5)
    w1 = jax.random.uniform(k1, (d_model, d_ff), jnp.float32, -lim1, lim1)
    b1 = jax.random.uniform(k2, (d_ff,), jnp.float32, -lim1, lim1)
    w2 = jax.random.uniform(k3, (d_ff, d_model), jnp.float32, -lim2, lim2)
    b2 = jax.random.uniform(k4, (d_model,), jnp.float32, -lim2, lim2)
    return w1, b1, w2, b2


if __name__ == "__main__":
    key = jax.random.PRNGKey(0)
    batch, seq, d_model, d_ff = 2, 8, 32, 400

    kx, kp, kx2 = jax.random.split(key, 3)
    x = jax.random.normal(kx, (batch, seq, d_model), jnp.float32)
    w1, b1, w2, b2 = init_params(kp, d_model, d_ff)
    params = prepare_params(w1, b1, w2, b2)   # one-time pad + bf16 cast (hoisted)

    def ref_fn(a):  # eval-mode reference (dropout = identity), f32 end to end
        return jnp.maximum(a @ w1 + b1, 0.0) @ w2 + b2

    # 1) Default path: weights fully resident, single-buffered.
    out = jax.block_until_ready(feed_forward(x, params))
    ref = ref_fn(x)
    assert out.shape == (batch, seq, d_model)
    err = float(jnp.max(jnp.abs(out - ref)))
    assert jnp.allclose(out, ref, atol=3e-2, rtol=3e-2), f"max_err={err}"

    # 2) Force the d_ff-blocked accumulator path (the v7x large-weight path).
    out_blk = jax.block_until_ready(feed_forward(x, params, ff_block=128))
    err_blk = float(jnp.max(jnp.abs(out_blk - ref)))
    assert jnp.allclose(out_blk, ref, atol=3e-2, rtol=3e-2), f"max_err={err_blk}"

    # 3) Row count that does not divide the row tile (clipped tail tile).
    x_odd = jax.random.normal(kx2, (3, 5, d_model), jnp.float32)
    out_odd = jax.block_until_ready(feed_forward(x_odd, params, tm=8))
    ref_odd = ref_fn(x_odd)
    err_odd = float(jnp.max(jnp.abs(out_odd - ref_odd)))
    assert jnp.allclose(out_odd, ref_odd, atol=3e-2, rtol=3e-2), f"max_err={err_odd}"

    print("KERNEL_OK")
</pallas_src>

<mosaic_0001>
module attributes {stable_mosaic.version = 11 : i64} {
  func.func @ffn_kernel(%arg0: i32, %arg1: i32, %arg2: memref<8x32xf32, #tpu.memory_space<vmem>>, %arg3: memref<32x512xbf16, #tpu.memory_space<vmem>>, %arg4: memref<1x512xf32, #tpu.memory_space<vmem>>, %arg5: memref<512x32xbf16, #tpu.memory_space<vmem>>, %arg6: memref<1x32xf32, #tpu.memory_space<vmem>>, %arg7: memref<8x32xf32, #tpu.memory_space<vmem>>, %arg8: memref<8x32xf32, #tpu.memory_space<vmem>>) attributes {dimension_semantics = [#tpu.dimension_semantics<parallel>, #tpu.dimension_semantics<arbitrary>], iteration_bounds = array<i64: 2, 1>, scalar_prefetch = 0 : i64, scratch_operands = 1 : i64, tpu.core_type = #tpu.core_type<tc>, window_params = [{transform_indices = @transform_0, window_bounds = array<i64: 8, 32>}, {pipeline_mode = #tpu.pipeline_mode<synchronous>, transform_indices = @transform_1, window_bounds = array<i64: 32, 512>}, {pipeline_mode = #tpu.pipeline_mode<synchronous>, transform_indices = @transform_2, window_bounds = array<i64: 1, 512>}, {pipeline_mode = #tpu.pipeline_mode<synchronous>, transform_indices = @transform_3, window_bounds = array<i64: 512, 32>}, {pipeline_mode = #tpu.pipeline_mode<synchronous>, transform_indices = @transform_4, window_bounds = array<i64: 1, 32>}, {transform_indices = @transform_5, window_bounds = array<i64: 8, 32>}]} {
    %c0_i32 = arith.constant 0 : i32
    %0 = arith.cmpi eq, %arg1, %c0_i32 : i32
    %1 = arith.extui %0 : i1 to i32
    %c0_i32_0 = arith.constant 0 : i32
    %2 = arith.cmpi ne, %1, %c0_i32_0 : i32
    scf.if %2 {
      %cst_16 = arith.constant 0.000000e+00 : f32
      %21 = vector.broadcast %cst_16 : f32 to vector<8x32xf32>
      %c0_17 = arith.constant 0 : index
      %c0_18 = arith.constant 0 : index
      %22 = vector.load %arg8[%c0_17, %c0_18] : memref<8x32xf32, #tpu.memory_space<vmem>>, vector<8x32xf32>
      tpu.vector_store %arg8[%c0_17, %c0_18], %21 {strides = array<i32>} : memref<8x32xf32, #tpu.memory_space<vmem>>, vector<8x32xf32>,
    } else {
    }
    %c0 = arith.constant 0 : index
    %c0_1 = arith.constant 0 : index
    %3 = vector.load %arg2[%c0, %c0_1] : memref<8x32xf32, #tpu.memory_space<vmem>>, vector<8x32xf32>
    %4 = arith.truncf %3 : vector<8x32xf32> to vector<8x32xbf16>
    %c0_2 = arith.constant 0 : index
    %c0_3 = arith.constant 0 : index
    %5 = vector.load %arg3[%c0_2, %c0_3] : memref<32x512xbf16, #tpu.memory_space<vmem>>, vector<32x512xbf16>
    %cst = arith.constant dense<0.000000e+00> : vector<8x512xf32>
    %6 = tpu.matmul %4, %5, %cst {dimension_numbers = #tpu.dot_dimension_numbers<[1], [0], [0], [1], [0, 0, 1, 1], [], []>} : vector<8x32xbf16>, vector<32x512xbf16>, vector<8x512xf32> -> vector<8x512xf32>
    %c0_4 = arith.constant 0 : index
    %c0_5 = arith.constant 0 : index
    %7 = vector.load %arg4[%c0_4, %c0_5] : memref<1x512xf32, #tpu.memory_space<vmem>>, vector<1x512xf32>
    %8 = vector.broadcast %7 : vector<1x512xf32> to vector<8x512xf32>
    %9 = arith.addf %6, %8 : vector<8x512xf32>
    %cst_6 = arith.constant 0.000000e+00 : f32
    %10 = vector.broadcast %cst_6 : f32 to vector<8x512xf32>
    %11 = arith.maximumf %9, %10 : vector<8x512xf32>
    %c0_7 = arith.constant 0 : index
    %c0_8 = arith.constant 0 : index
    %12 = vector.load %arg8[%c0_7, %c0_8] : memref<8x32xf32, #tpu.memory_space<vmem>>, vector<8x32xf32>
    %13 = arith.truncf %11 : vector<8x512xf32> to vector<8x512xbf16>
    %c0_9 = arith.constant 0 : index
    %c0_10 = arith.constant 0 : index
    %14 = vector.load %arg5[%c0_9, %c0_10] : memref<512x32xbf16, #tpu.memory_space<vmem>>, vector<512x32xbf16>
    %cst_11 = arith.constant dense<0.000000e+00> : vector<8x32xf32>
    %15 = tpu.matmul %13, %14, %cst_11 {dimension_numbers = #tpu.dot_dimension_numbers<[1], [0], [0], [1], [0, 0, 1, 1], [], []>} : vector<8x512xbf16>, vector<512x32xbf16>, vector<8x32xf32> -> vector<8x32xf32>
    %16 = arith.addf %12, %15 : vector<8x32xf32>
    %c0_12 = arith.constant 0 : index
    %c0_13 = arith.constant 0 : index
    %17 = vector.load %arg8[%c0_12, %c0_13] : memref<8x32xf32, #tpu.memory_space<vmem>>, vector<8x32xf32>
    tpu.vector_store %arg8[%c0_12, %c0_13], %16 {strides = array<i32>} : memref<8x32xf32, #tpu.memory_space<vmem>>, vector<8x32xf32>,
    %c0_i32_14 = arith.constant 0 : i32
    %18 = arith.cmpi eq, %arg1, %c0_i32_14 : i32
    %19 = arith.extui %18 : i1 to i32
    %c0_i32_15 = arith.constant 0 : i32
    %20 = arith.cmpi ne, %19, %c0_i32_15 : i32
    scf.if %20 {
      %c0_16 = arith.constant 0 : index
      %c0_17 = arith.constant 0 : index
      %21 = vector.load %arg8[%c0_16, %c0_17] : memref<8x32xf32, #tpu.memory_space<vmem>>, vector<8x32xf32>
      %c0_18 = arith.constant 0 : index
      %c0_19 = arith.constant 0 : index
      %22 = vector.load %arg6[%c0_18, %c0_19] : memref<1x32xf32, #tpu.memory_space<vmem>>, vector<1x32xf32>
      %23 = vector.broadcast %22 : vector<1x32xf32> to vector<8x32xf32>
      %24 = arith.addf %21, %23 : vector<8x32xf32>
      %c0_20 = arith.constant 0 : index
      %c0_21 = arith.constant 0 : index
      %25 = vector.load %arg7[%c0_20, %c0_21] : memref<8x32xf32, #tpu.memory_space<vmem>>, vector<8x32xf32>
      tpu.vector_store %arg7[%c0_20, %c0_21], %24 {strides = array<i32>} : memref<8x32xf32, #tpu.memory_space<vmem>>, vector<8x32xf32>,
    } else {
    }
    return
  }
  func.func @transform_0(%arg0: i32, %arg1: i32) -> (i32, i32) {
    %c0_i32 = arith.constant 0 : i32
    %c0_i32_0 = arith.constant 0 : i32
    return %arg0, %c0_i32 : i32, i32
  }
  func.func @transform_1(%arg0: i32, %arg1: i32) -> (i32, i32) {
    %c0_i32 = arith.constant 0 : i32
    %c0_i32_0 = arith.constant 0 : i32
    return %c0_i32, %arg1 : i32, i32
  }
  func.func @transform_2(%arg0: i32, %arg1: i32) -> (i32, i32) {
    %c0_i32 = arith.constant 0 : i32
    %c0_i32_0 = arith.constant 0 : i32
    return %c0_i32, %arg1 : i32, i32
  }
  func.func @transform_3(%arg0: i32, %arg1: i32) -> (i32, i32) {
    %c0_i32 = arith.constant 0 : i32
    %c0_i32_0 = arith.constant 0 : i32
    return %arg1, %c0_i32 : i32, i32
  }
  func.func @transform_4(%arg0: i32, %arg1: i32) -> (i32, i32) {
    %c0_i32 = arith.constant 0 : i32
    %c0_i32_0 = arith.constant 0 : i32
    %c0_i32_1 = arith.constant 0 : i32
    return %c0_i32, %c0_i32_0 : i32, i32
  }
  func.func @transform_5(%arg0: i32, %arg1: i32) -> (i32, i32) {
    %c0_i32 = arith.constant 0 : i32
    %c0_i32_0 = arith.constant 0 : i32
    return %arg0, %c0_i32 : i32, i32
  }
}

module attributes {stable_mosaic.version = 11 : i64} {
  func.func @ffn_kernel(%arg0: i32, %arg1: i32, %arg2: memref<8x32xf32, #tpu.memory_space<vmem>>, %arg3: memref<32x512xbf16, #tpu.memory_space<vmem>>, %arg4: memref<1x512xf32, #tpu.memory_space<vmem>>, %arg5: memref<512x32xbf16, #tpu.memory_space<vmem>>, %arg6: memref<1x32xf32, #tpu.memory_space<vmem>>, %arg7: memref<8x32xf32, #tpu.memory_space<vmem>>, %arg8: memref<8x32xf32, #tpu.memory_space<vmem>>) attributes {dimension_semantics = [#tpu.dimension_semantics<parallel>, #tpu.dimension_semantics<arbitrary>], iteration_bounds = array<i64: 2, 1>, scalar_prefetch = 0 : i64, scratch_operands = 1 : i64, tpu.core_type = #tpu.core_type<tc>, window_params = [{transform_indices = @transform_0, window_bounds = array<i64: 8, 32>}, {transform_indices = @transform_1, window_bounds = array<i64: 32, 512>}, {transform_indices = @transform_2, window_bounds = array<i64: 1, 512>}, {transform_indices = @transform_3, window_bounds = array<i64: 512, 32>}, {pipeline_mode = #tpu.pipeline_mode<synchronous>, transform_indices = @transform_4, window_bounds = array<i64: 1, 32>}, {transform_indices = @transform_5, window_bounds = array<i64: 8, 32>}]} {
    %c0_i32 = arith.constant 0 : i32
    %0 = arith.cmpi eq, %arg1, %c0_i32 : i32
    %1 = arith.extui %0 : i1 to i32
    %c0_i32_0 = arith.constant 0 : i32
    %2 = arith.cmpi ne, %1, %c0_i32_0 : i32
    scf.if %2 {
      %cst_16 = arith.constant 0.000000e+00 : f32
      %21 = vector.broadcast %cst_16 : f32 to vector<8x32xf32>
      %c0_17 = arith.constant 0 : index
      %c0_18 = arith.constant 0 : index
      %22 = vector.load %arg8[%c0_17, %c0_18] : memref<8x32xf32, #tpu.memory_space<vmem>>, vector<8x32xf32>
      tpu.vector_store %arg8[%c0_17, %c0_18], %21 {strides = array<i32>} : memref<8x32xf32, #tpu.memory_space<vmem>>, vector<8x32xf32>,
    } else {
    }
    %c0 = arith.constant 0 : index
    %c0_1 = arith.constant 0 : index
    %3 = vector.load %arg2[%c0, %c0_1] : memref<8x32xf32, #tpu.memory_space<vmem>>, vector<8x32xf32>
    %4 = arith.truncf %3 : vector<8x32xf32> to vector<8x32xbf16>
    %c0_2 = arith.constant 0 : index
    %c0_3 = arith.constant 0 : index
    %5 = vector.load %arg3[%c0_2, %c0_3] : memref<32x512xbf16, #tpu.memory_space<vmem>>, vector<32x512xbf16>
    %cst = arith.constant dense<0.000000e+00> : vector<8x512xf32>
    %6 = tpu.matmul %4, %5, %cst {dimension_numbers = #tpu.dot_dimension_numbers<[1], [0], [0], [1], [0, 0, 1, 1], [], []>} : vector<8x32xbf16>, vector<32x512xbf16>, vector<8x512xf32> -> vector<8x512xf32>
    %c0_4 = arith.constant 0 : index
    %c0_5 = arith.constant 0 : index
    %7 = vector.load %arg4[%c0_4, %c0_5] : memref<1x512xf32, #tpu.memory_space<vmem>>, vector<1x512xf32>
    %8 = vector.broadcast %7 : vector<1x512xf32> to vector<8x512xf32>
    %9 = arith.addf %6, %8 : vector<8x512xf32>
    %cst_6 = arith.constant 0.000000e+00 : f32
    %10 = vector.broadcast %cst_6 : f32 to vector<8x512xf32>
    %11 = arith.maximumf %9, %10 : vector<8x512xf32>
    %c0_7 = arith.constant 0 : index
    %c0_8 = arith.constant 0 : index
    %12 = vector.load %arg8[%c0_7, %c0_8] : memref<8x32xf32, #tpu.memory_space<vmem>>, vector<8x32xf32>
    %13 = arith.truncf %11 : vector<8x512xf32> to vector<8x512xbf16>
    %c0_9 = arith.constant 0 : index
    %c0_10 = arith.constant 0 : index
    %14 = vector.load %arg5[%c0_9, %c0_10] : memref<512x32xbf16, #tpu.memory_space<vmem>>, vector<512x32xbf16>
    %cst_11 = arith.constant dense<0.000000e+00> : vector<8x32xf32>
    %15 = tpu.matmul %13, %14, %cst_11 {dimension_numbers = #tpu.dot_dimension_numbers<[1], [0], [0], [1], [0, 0, 1, 1], [], []>} : vector<8x512xbf16>, vector<512x32xbf16>, vector<8x32xf32> -> vector<8x32xf32>
    %16 = arith.addf %12, %15 : vector<8x32xf32>
    %c0_12 = arith.constant 0 : index
    %c0_13 = arith.constant 0 : index
    %17 = vector.load %arg8[%c0_12, %c0_13] : memref<8x32xf32, #tpu.memory_space<vmem>>, vector<8x32xf32>
    tpu.vector_store %arg8[%c0_12, %c0_13], %16 {strides = array<i32>} : memref<8x32xf32, #tpu.memory_space<vmem>>, vector<8x32xf32>,
    %c0_i32_14 = arith.constant 0 : i32
    %18 = arith.cmpi eq, %arg1, %c0_i32_14 : i32
    %19 = arith.extui %18 : i1 to i32
    %c0_i32_15 = arith.constant 0 : i32
    %20 = arith.cmpi ne, %19, %c0_i32_15 : i32
    scf.if %20 {
      %c0_16 = arith.constant 0 : index
      %c0_17 = arith.constant 0 : index
      %21 = vector.load %arg8[%c0_16, %c0_17] : memref<8x32xf32, #tpu.memory_space<vmem>>, vector<8x32xf32>
      %c0_18 = arith.constant 0 : index
      %c0_19 = arith.constant 0 : index
      %22 = vector.load %arg6[%c0_18, %c0_19] : memref<1x32xf32, #tpu.memory_space<vmem>>, vector<1x32xf32>
      %23 = vector.broadcast %22 : vector<1x32xf32> to vector<8x32xf32>
      %24 = arith.addf %21, %23 : vector<8x32xf32>
      %c0_20 = arith.constant 0 : index
      %c0_21 = arith.constant 0 : index
      %25 = vector.load %arg7[%c0_20, %c0_21] : memref<8x32xf32, #tpu.memory_space<vmem>>, vector<8x32xf32>
      tpu.vector_store %arg7[%c0_20, %c0_21], %24 {strides = array<i32>} : memref<8x32xf32, #tpu.memory_space<vmem>>, vector<8x32xf32>,
    } else {
    }
    return
  }
  func.func @transform_0(%arg0: i32, %arg1: i32) -> (i32, i32) {
    %c0_i32 = arith.constant 0 : i32
    %c0_i32_0 = arith.constant 0 : i32
    return %arg0, %c0_i32 : i32, i32
  }
  func.func @transform_1(%arg0: i32, %arg1: i32) -> (i32, i32) {
    %c0_i32 = arith.constant 0 : i32
    %c0_i32_0 = arith.constant 0 : i32
    return %c0_i32, %arg1 : i32, i32
  }
  func.func @transform_2(%arg0: i32, %arg1: i32) -> (i32, i32) {
    %c0_i32 = arith.constant 0 : i32
    %c0_i32_0 = arith.constant 0 : i32
    return %c0_i32, %arg1 : i32, i32
  }
  func.func @transform_3(%arg0: i32, %arg1: i32) -> (i32, i32) {
    %c0_i32 = arith.constant 0 : i32
    %c0_i32_0 = arith.constant 0 : i32
    return %arg1, %c0_i32 : i32, i32
  }
  func.func @transform_4(%arg0: i32, %arg1: i32) -> (i32, i32) {
    %c0_i32 = arith.constant 0 : i32
    %c0_i32_0 = arith.constant 0 : i32
    %c0_i32_1 = arith.constant 0 : i32
    return %c0_i32, %c0_i32_0 : i32, i32
  }
  func.func @transform_5(%arg0: i32, %arg1: i32) -> (i32, i32) {
    %c0_i32 = arith.constant 0 : i32
    %c0_i32_0 = arith.constant 0 : i32
    return %arg0, %c0_i32 : i32, i32
  }
}

</mosaic_0001>

<bundles_post_ra>
// kernel: tpu_custom_call.1
= control target key start
LH: loop header
LB: loop body
LE: loop exit
PB: predicated region body
PF: predicated region fallthrough
CT: control target
= control target key end

     0   :  { %10 = vsyncpa [#allocation4], 0  ;;  %s1501_s0 = inlined_call_operand.vmem [shape: f32[16,32], index: 0, kind: input, shape index: {}]   ;;  %s1502_s1 = inlined_call_operand.vmem [shape: bf16[32,512], index: 1, kind: input, shape index: {}]   ;;  %s1503_s2 = inlined_call_operand.vmem [shape: f32[1,512], index: 2, kind: input, shape index: {}]   ;;  %s1504_s3 = inlined_call_operand.vmem [shape: bf16[512,32], index: 3, kind: input, shape index: {}]   ;;  %s1505_s4 = inlined_call_operand.vmem [shape: f32[1,32], index: 4, kind: input, shape index: {}]   ;;  %s1506_s5 = inlined_call_operand.hbm [shape: f32[16,32], index: 5, kind: output, shape index: {}]  }
   0x1   :  { %12 = vsyncpa [#allocation4 + $0x1], 0  ;;  %s1258_s18 = smov 0   ;;  %s1260_s19 = smov 0  }
   0x2   :  { %s1262_s20 = smov 0   ;;  %s1264_s21 = smov 0  }
   0x3   :  { %s1266_s22 = smov 0   ;;  %s1268_s23 = smov 0  }
   0x4 LB: > { %s943_s24 = sadd.s32 4294967295, %s1223_s23   ;;  %s944_s25 = sadd.s32 4294967294, %s1223_s23   ;;  %s1223_s23 = sphi %s1268_s23, %s18_s23   ;;  %s1219_s22 = sphi %s1266_s22, %s1513_s22   ;;  %s1215_s21 = sphi %s1264_s21, %s1512_s21   ;;  %s1211_s20 = sphi %s1262_s20, %s1511_s20   ;;  %s1207_s19 = sphi %s1260_s19, %s1510_s19   ;;  %s1203_s18 = sphi %s1258_s18, %s1509_s18  }
   0x5   : > { %s30_s26 = sadd.s32 1, %s1219_s22  ;;  %s162_s27 = sadd.s32 1, %s1211_s20 }
   0x6   : > { %p32_p0 = scmp.ge.s32.totalorder %s30_s26, 2  ;;  %p172_p1 = scmp.ne.s32.totalorder %s1211_s20, %s1207_s19 }
   0x7   : > { %p173_p2 = scmp.eq.s32.totalorder %s943_s24, 1  ;;  %p178_p3 = scmp.ne.s32.totalorder %s1207_s19, %s1203_s18 }
   0x8   : > { %s1515_s26 = smov (%p32_p0, %s30_s26), 0  ;;  %p179_p5 = scmp.eq.s32.totalorder %s944_s25, 1 }
   0x9   : > { %p1298_p4 = por %p173_p2, %p172_p1  ;;  %s159_s29 = ssub.s32 %s1219_s22, %s1515_s26 }
   0xa   : > { %p950_p6 = scmp.ge.s32.totalorder %s1223_s23, 1  ;;  %p160_p7 = scmp.eq.s32.totalorder %s159_s29, 0 }
   0xb   : > { %p1305_p8 = por %p179_p5, %p178_p3  ;;  %p233_p9 = scmp.lt.s32.totalorder %s1223_s23, 3 }
   0xc   : > { %s1311_s6 = scalar_select %p160_p7, %s1211_s20, %s162_s27  }
   0xd   : > { %p234_p10 = pnand %p950_p6, %p233_p9 }
   0xe   : > { %v1101_v0 = vld [vmem:[%s1502_s1 + $0x4] ss:$16 sps:$4 sm:$0xff] (!%p234_p10)   ;;  %p274_p11 = scmp.lt.s32.totalorder (!%p234_p10), %s1215_s21, 1  ;;  %v1103_v1 = vld [vmem:[%s1502_s1 + $0xc] ss:$16 sps:$4 sm:$0xff] (!%p234_p10)   ;;  %v1225_v2 = vmov (!%p234_p10), 0   ;;  %v314_v44 = vlaneseq (!%p234_p10) }
   0xf   : > { %237 = sbr.rel (%p234_p10) target bundleno = 492 (0x1ec), region = 40  ;;  %410 = vmatprep.mubr.bf16.mxu0 (!%p234_p10), %v1225_v2  ;;  %451 = vmatprep.mubr.bf16.mxu1 (!%p234_p10), %v1225_v2  ;;  %vm300_vm0 = vcmask (!%p234_p10), 261120   ;;  %v1105_v3 = vld [vmem:[%s1502_s1] ss:$16 sps:$4 sm:$0xff] (!%p234_p10)   ;;  %v1106_v4 = vld [vmem:[%s1502_s1 + $0x8] ss:$16 sps:$4 sm:$0xff] (!%p234_p10)  }
  0x10   : > { %378 = vmatprep.subr.bf16.mxu0 (!%p234_p10), %v1101_v0  ;;  %v1226_v5 = vmov (!%p234_p10), 0.0   ;;  %419 = vmatprep.subr.bf16.mxu1 (!%p234_p10), %v1103_v1  ;;  %v1107_v6 = vld [vmem:[%s1502_s1 + $0x24] ss:$16 sps:$4 sm:$0xff] (!%p234_p10)   ;;  %v1109_v7 = vld [vmem:[%s1502_s1 + $0x2c] ss:$16 sps:$4 sm:$0xff] (!%p234_p10)   ;;  %v315_v45 = vshrl.u32 (!%p234_p10), %v314_v44, 7 }
  0x11   : > { %301 = vst.msk [vmem:[#allocation2] sm:$0xff] (!%p234_p10), %vm300_vm0, %v1226_v5  ;;  %379 = vmatpush1.bf16.msra.mxu0 (!%p234_p10), %v1105_v3  ;;  %420 = vmatpush1.bf16.msra.mxu1 (!%p234_p10), %v1106_v4  ;;  %v1111_v8 = vld [vmem:[%s1502_s1 + $0x20] ss:$16 sps:$4 sm:$0xff] (!%p234_p10)   ;;  %v1112_v9 = vld [vmem:[%s1502_s1 + $0x28] ss:$16 sps:$4 sm:$0xff] (!%p234_p10)   ;;  %s271_s25 = sand.u32 (!%p234_p10), 1, %s1207_s19  }
  0x12   : > { %380 = vmatprep.subr.bf16.mxu0 (!%p234_p10), %v1107_v6  ;;  %421 = vmatprep.subr.bf16.mxu1 (!%p234_p10), %v1109_v7  ;;  %v1113_v11 = vld [vmem:[%s1504_s3 + $0x40] sm:$0xff] (!%p234_p10)   ;;  %v1117_v16 = vld [vmem:[%s1504_s3 + $0x48] sm:$0xff] (!%p234_p10)   ;;  %v1121_v20 = vld [vmem:[%s1504_s3 + $0x50] sm:$0xff] (!%p234_p10)   ;;  %v316_v46 = vsub.s32 (!%p234_p10), 0, %v315_v45  ;;  %v324_v47 = vsub.s32 (!%p234_p10), 2, %v315_v45  ;;  %v320_v49 = vsub.s32 (!%p234_p10), 1, %v315_v45 }
  0x13   : > { %v1114_v13 = vld [vmem:[%s1504_s3 + $0xc0] sm:$0xff] (!%p234_p10)   ;;  %v1118_v17 = vld [vmem:[%s1504_s3 + $0xc8] sm:$0xff] (!%p234_p10)   ;;  %v1122_v21 = vld [vmem:[%s1504_s3 + $0xd0] sm:$0xff] (!%p234_p10)   ;;  %v328_v50 = vsub.s32 (!%p234_p10), 3, %v315_v45  ;;  %s951_s27 = sshll.u32 (!%p234_p10), %s271_s25, 3  ;;  %s997_s8 = sshll.u32 (!%p234_p10), %s1215_s21, 7 }
  0x14   : > { %v1115_v14 = vld [vmem:[%s1504_s3] sm:$0xff] (!%p234_p10)   ;;  %v1119_v18 = vld [vmem:[%s1504_s3 + $0x8] sm:$0xff] (!%p234_p10)   ;;  %v1123_v22 = vld [vmem:[%s1504_s3 + $0x10] sm:$0xff] (!%p234_p10)   ;;  %s273_s9 = scalar_lea.vmem (!%p234_p10), [#allocation3], %s951_s27  ;;  %s1453_s13 = scalar_lea.hbm (!%p234_p10), %s1506_s5, %s997_s8 }
  0x15   : > { %381 = vmatpush1.bf16.msra.mxu0 (!%p234_p10), %v1111_v8  ;;  %422 = vmatpush1.bf16.msra.mxu1 (!%p234_p10), %v1112_v9  ;;  %v1116_v15 = vld [vmem:[%s1504_s3 + $0x80] sm:$0xff] (!%p234_p10)   ;;  %v1120_v19 = vld [vmem:[%s1504_s3 + $0x88] sm:$0xff] (!%p234_p10)   ;;  %v1124_v23 = vld [vmem:[%s1504_s3 + $0x90] sm:$0xff] (!%p234_p10)   ;;  %s834_s10 = sshll.u32 (!%p234_p10), %s273_s9, 4  ;;  %s821_s14 = scalar_lea.sflag (!%p234_p10), [#allocation4], %s271_s25  ;;  %s1455_s10 = int_to_ptr.vmem [resolvable:$true] %s834_s10 }
  0x16   : > { %s275_s15 = scalar_select %p274_p11, %s1215_s21, 1  ;;  %1000 = vmatprep.subr.bf16.mxu0 %v1113_v11  ;;  %1022 = vmatprep.subr.bf16.mxu1 %v1114_v13  ;;  %v1125_v24 = vld [vmem:[%s1504_s3 + $0x58] sm:$0xff]   ;;  %v1129_v28 = vld [vmem:[%s1504_s3 + $0x60] sm:$0xff]   ;;  %v1133_v32 = vld [vmem:[%s1504_s3 + $0x68] sm:$0xff]  }
  0x17   : > { %v1126_v25 = vld [vmem:[%s1504_s3 + $0xd8] sm:$0xff]   ;;  %v1130_v29 = vld [vmem:[%s1504_s3 + $0xe0] sm:$0xff]   ;;  %v1134_v33 = vld [vmem:[%s1504_s3 + $0xe8] sm:$0xff]   ;;  %s1145_s16 = scalar_lea.vmem %s1455_s10, 128  ;;  %s1227_s21 = smov [#allocation3]  }
  0x18   : > { %s952_s7 = sshll.u32 %s275_s15, 3  ;;  %v1127_v26 = vld [vmem:[%s1504_s3 + $0x18] sm:$0xff]   ;;  %v1131_v30 = vld [vmem:[%s1504_s3 + $0x20] sm:$0xff]   ;;  %v1135_v34 = vld [vmem:[%s1504_s3 + $0x28] sm:$0xff]   ;;  %p1146_p12 = scmp.ne.s32.totalorder %s1455_s10, %s1145_s16 }
  0x19   : > { %s277_s12 = scalar_lea.vmem %s1501_s0, %s952_s7  ;;  %v1128_v27 = vld [vmem:[%s1504_s3 + $0x98] sm:$0xff]   ;;  %v1132_v31 = vld [vmem:[%s1504_s3 + $0xa0] sm:$0xff]   ;;  %v1136_v35 = vld [vmem:[%s1504_s3 + $0xa8] sm:$0xff]   ;;  %s1149_s17 = sshll.u32 %s1227_s21, 4  ;;  %s1150_s17 = int_to_ptr.vmem [resolvable:$false] %s1149_s17 }
  0x1a   : > { %v302_v10 = vld [vmem:[%s277_s12] sm:$0xff]  ;;  %v1137_v36 = vld [vmem:[%s1504_s3 + $0x70] sm:$0xff]   ;;  %v1141_v40 = vld [vmem:[%s1504_s3 + $0x78] sm:$0xff]   ;;  %p1147_p13 = pnand %p1146_p12, %p1298_p4  ;;  %s1151_s15 = scalar_lea.vmem %s1150_s17, 256 }
  0x1b   : > { %v303_v12 = vpack.c.bf16 %v302_v10, %v302_v10  ;;  %v1138_v37 = vld [vmem:[%s1504_s3 + $0xf0] sm:$0xff]   ;;  %v1142_v41 = vld [vmem:[%s1504_s3 + $0xf8] sm:$0xff]   ;;  %v312_v48 = vld [vmem:[%s1503_s2] sm:$0xf]  ;;  %p1152_p1 = scmp.lt.s32.totalorder %s1455_s10, %s1150_s17  ;;  %p1153_p2 = scmp.lt.s32.totalorder %s1151_s15, %s1145_s16 }
  0x1c   : > { %v1139_v38 = vld [vmem:[%s1504_s3 + $0x30] sm:$0xff]   ;;  %v1143_v42 = vld [vmem:[%s1504_s3 + $0x38] sm:$0xff]   ;;  %v317_v51 = vrot.slane %v312_v48, %v316_v46  ;;  %v325_v52 = vrot.slane %v312_v48, %v324_v47  ;;  %v321_v53 = vrot.slane %v312_v48, %v320_v49  ;;  %v329_v54 = vrot.slane %v312_v48, %v328_v50  ;;  %p1148_p0 = pneg %p1147_p13 }
  0x1d   : > { %961 = vmatmul.mubr.msk.bf16.vlgmr.msra.gmra.mrb[0].mxu0 %vm300_vm0, %v303_v12  ;;  %962 = vmatmul.mubr.msk.bf16.vlgmr.msra.gmra.mrb[0].mxu1 %vm300_vm0, %v303_v12  ;;  %v1140_v39 = vld [vmem:[%s1504_s3 + $0xb0] sm:$0xff]   ;;  %v1144_v43 = vld [vmem:[%s1504_s3 + $0xb8] sm:$0xff]   ;;  %p1154_p3 = por %p1153_p2, %p1152_p1 }
  0x1e   : > { %1001 = vmatpush3.bf16.msra.mxu0 %v1115_v14  ;;  %1023 = vmatpush3.bf16.msra.mxu1 %v1116_v15 }
  0x1f   : > { %1002 = vmatprep.subr.bf16.mxu0 %v1117_v16  ;;  %1024 = vmatprep.subr.bf16.mxu1 %v1118_v17  ;;  %p1155_p5 = pnand %p1154_p3, %p1148_p0 }
  0x22   : > { %1003 = vmatpush3.bf16.msra.mxu0 %v1119_v18  ;;  %1025 = vmatpush3.bf16.msra.mxu1 %v1120_v19  ;;  %v464_v19 = vld [vmem:[#allocation2] sm:$0xff] }
  0x23   : > { %1004 = vmatprep.subr.bf16.mxu0 %v1121_v20  ;;  %1026 = vmatprep.subr.bf16.mxu1 %v1122_v21 }
  0x26   : > { %1005 = vmatpush3.bf16.msra.mxu0 %v1123_v22  ;;  %1027 = vmatpush3.bf16.msra.mxu1 %v1124_v23 }
  0x27   : > { %1006 = vmatprep.subr.bf16.mxu0 %v1125_v24  ;;  %1028 = vmatprep.subr.bf16.mxu1 %v1126_v25  ;;  %v995_v24 = vld [vmem:[%s1505_s4] ss:$0 sm:$0xff] }
  0x2a   : > { %1007 = vmatpush3.bf16.msra.mxu0 %v1127_v26  ;;  %1029 = vmatpush3.bf16.msra.mxu1 %v1128_v27 }
  0x2b   : > { %1008 = vmatprep.subr.bf16.mxu0 %v1129_v28  ;;  %1030 = vmatprep.subr.bf16.mxu1 %v1130_v29 }
  0x2e   : > { %1009 = vmatpush3.bf16.msra.mxu0 %v1131_v30  ;;  %1031 = vmatpush3.bf16.msra.mxu1 %v1132_v31 }
  0x2f   : > { %1010 = vmatprep.subr.bf16.mxu0 %v1133_v32  ;;  %1032 = vmatprep.subr.bf16.mxu1 %v1134_v33 }
  0x32   : > { %1011 = vmatpush3.bf16.msra.mxu0 %v1135_v34  ;;  %1033 = vmatpush3.bf16.msra.mxu1 %v1136_v35 }
  0x33   : > { %1012 = vmatprep.subr.bf16.mxu0 %v1137_v36  ;;  %1034 = vmatprep.subr.bf16.mxu1 %v1138_v37 }
  0x36   : > { %1013 = vmatpush3.bf16.msra.mxu0 %v1139_v38  ;;  %1035 = vmatpush3.bf16.msra.mxu1 %v1140_v39 }
  0x37   : > { %1014 = vmatprep.subr.bf16.mxu0 %v1141_v40  ;;  %1036 = vmatprep.subr.bf16.mxu1 %v1142_v41 }
  0x3a   : > { %1015 = vmatpush3.bf16.msra.mxu0 %v1143_v42  ;;  %1037 = vmatpush3.bf16.msra.mxu1 %v1144_v43 }
  0xf0   : > { %v412_v55 = vpop.f32.mrb[0].mxu0  ;;  %v453_v56 = vpop.f32.mrb[0].mxu1 }
  0xf1   : > { %v413_v57 = vadd.f32 %v412_v55, %v317_v51  ;;  %v454_v58 = vadd.f32 %v453_v56, %v325_v52  ;;  %v414_v59 = vpop.f32.mrb[1].mxu0  ;;  %v455_v60 = vpop.f32.mrb[1].mxu1 }
  0xf2   : > { %v415_v61 = vadd.f32 %v414_v59, %v321_v53  ;;  %v456_v62 = vadd.f32 %v455_v60, %v329_v54  ;;  %v416_v63 = vpop.f32.mrb[2].mxu0  ;;  %v457_v0 = vpop.f32.mrb[2].mxu1 }
  0xf3   : > { %v460_v1 = vmax.f32 %v413_v57, 0.0  ;;  %v462_v2 = vmax.f32 %v454_v58, 0.0  ;;  %v417_v3 = vpop.f32.mrb[3].mxu0  ;;  %v458_v4 = vpop.f32.mrb[3].mxu1 }
  0xf4   : > { %v461_v5 = vmax.f32 %v415_v61, 0.0  ;;  %v463_v6 = vmax.f32 %v456_v62, 0.0 }
  0xf5   : > { %v465_v9 = vpack.c.bf16 %v460_v1, %v460_v1  ;;  %v467_v10 = vpack.c.bf16 %v462_v2, %v462_v2 }
  0xf6   : > { %v466_v7 = vpack.c.bf16 %v461_v5, %v461_v5  ;;  %v468_v8 = vpack.c.bf16 %v463_v6, %v463_v6 }
  0xf8   : > { %757 = vmatprep.mubr.bf16.mxu0 %v466_v7  ;;  %797 = vmatprep.mubr.bf16.mxu1 %v468_v8 }
  0xf9   : > { %758 = vmatmul.mubr.bf16.vlgmr.msra.gmra.mrb[4].mxu0 %v465_v9  ;;  %798 = vmatmul.mubr.bf16.vlgmr.msra.gmra.mrb[4].mxu1 %v467_v10 }
 0x1cc   : > { %v1016_v11 = vpop.f32.mrb[4].mxu0  ;;  %v1038_v12 = vpop.f32.mrb[4].mxu1 }
 0x1cd   : > { %v1017_v13 = vpop.f32.mrb[5].mxu0  ;;  %v1039_v14 = vpop.f32.mrb[5].mxu1 }
 0x1ce   : > { %v1018_v15 = vadd.f32 %v1017_v13, %v1016_v11  ;;  %v1040_v16 = vadd.f32 %v1039_v14, %v1038_v12  ;;  %v1019_v17 = vpop.f32.mrb[6].mxu0  ;;  %v1041_v18 = vpop.f32.mrb[6].mxu1 }
 0x1cf   : > { %v1020_v20 = vpop.f32.mrb[7].mxu0  ;;  %v1042_v21 = vpop.f32.mrb[7].mxu1 }
 0x1d0   : > { %v800_v22 = vadd.f32 %v1040_v16, %v1018_v15 }
 0x1d2   : > { %v805_v23 = vadd.f32 %v800_v22, %v464_v19 }
 0x1d4   : > { %806 = vst.msk [vmem:[#allocation2] sm:$0xff] %vm300_vm0, %v805_v23 }
 0x1db   : > { %v810_v25 = vld [vmem:[#allocation2] sm:$0xff] }
 0x1dc   : > { %v818_v26 = vadd.f32 %v995_v24, %v810_v25 }
 0x1de   : > { %819 = vst.msk [vmem:[%s273_s9] sm:$0xff] %vm300_vm0, %v818_v26 }
 0x1df   : > { %1158 = shalt.err (!%p1155_p5)
}
 0x1e0   : > { %s1159_s24 = scalar_lea.hbm %s1453_s13, 128  ;;  %s1163_s29 = scalar_lea.hbm %s1506_s5, 256 }
 0x1e1   : > { %p1160_p6 = scmp.ne.s32.totalorder %s1453_s13, %s1159_s24  ;;  %p1164_p10 = scmp.lt.u32.totalorder %s1453_s13, %s1506_s5 }
 0x1e2   : > { %p1165_p11 = scmp.lt.u32.totalorder %s1163_s29, %s1159_s24  ;;  %p1167_p13 = scmp.lt.u32.totalorder %s1159_s24, %s1453_s13 }
 0x1e3   : > { %p1161_p7 = pnand %p1160_p6, %p1298_p4 }
 0x1e4   : > { %p1166_p12 = por %p1165_p11, %p1164_p10 }
 0x1e5   : > { %p1162_p9 = pneg %p1161_p7 }
 0x1e6   : > { %p1168_p0 = por %p1167_p13, %p1166_p12 }
 0x1e8   : > { %p1169_p1 = pnand %p1168_p0, %p1162_p9 }
 0x1ea   : > { %1172 = shalt.err (!%p1169_p1)
}
 0x1eb   : > { %1044 = dma.vmem_to_hbm [thread:$0]  (%p1298_p4), %s1455_s10, 128, %s1453_s13, %s821_s14  }
 0x1ec PF: > { %p1050_p2 = scmp.ge.s32.totalorder %s1223_s23, 2  ;;  %s846_s9 = sand.u32 1, %s1203_s18  }
 0x1ed   : > { %s847_s11 = scalar_lea.sflag [#allocation4], %s846_s9 }
 0x1ee   : > { %p1047_p3 = pnand %p1050_p2, %p1305_p8 }
 0x1f0   : > { %1198 = dma.done.wait (!%p1047_p3), %s847_s11, 128  }
 0x1f1   : > { %1200 = vsyncadd (!%p1047_p3), %s847_s11, 4294967168  ;;  %s18_s23 = sadd.s32 1, %s1223_s23   ;;  %s1509_s18 = smov %s1207_s19 }
 0x1f2   : > { %p15_p5 = scmp.ge.s32.totalorder %s18_s23, 4   ;;  %s1510_s19 = smov %s1211_s20 }
 0x1f3   : > { %s1511_s20 = smov %s1311_s6  ;;  %s1512_s21 = smov %s1219_s22 }
 0x1f4   : > { %s1513_s22 = smov %s1515_s26  ;;  %17 = sbr.rel (!%p15_p5) target bundleno = 4 (0x4), region = 92 }
 0x1fb   :  { %852 = vsyncpa [#allocation4], 1 }
 0x1fc   :  { %854 = vsyncpa [#allocation4 + $0x1], 1 }

// kernel: tpu_custom_call.1
= control target key start
LH: loop header
LB: loop body
LE: loop exit
PB: predicated region body
PF: predicated region fallthrough
CT: control target
= control target key end

     0   :  { %10 = vsyncpa [#allocation4], 0  ;;  %s1501_s0 = inlined_call_operand.vmem [shape: f32[16,32], index: 0, kind: input, shape index: {}]   ;;  %s1502_s1 = inlined_call_operand.vmem [shape: bf16[32,512], index: 1, kind: input, shape index: {}]   ;;  %s1503_s2 = inlined_call_operand.vmem [shape: f32[1,512], index: 2, kind: input, shape index: {}]   ;;  %s1504_s3 = inlined_call_operand.vmem [shape: bf16[512,32], index: 3, kind: input, shape index: {}]   ;;  %s1505_s4 = inlined_call_operand.vmem [shape: f32[1,32], index: 4, kind: input, shape index: {}]   ;;  %s1506_s5 = inlined_call_operand.hbm [shape: f32[16,32], index: 5, kind: output, shape index: {}]  }
   0x1   :  { %12 = vsyncpa [#allocation4 + $0x1], 0  ;;  %s1258_s18 = smov 0   ;;  %s1260_s19 = smov 0  }
   0x2   :  { %s1262_s20 = smov 0   ;;  %s1264_s21 = smov 0  }
   0x3   :  { %s1266_s22 = smov 0   ;;  %s1268_s23 = smov 0  }
   0x4 LB: > { %s943_s24 = sadd.s32 4294967295, %s1223_s23   ;;  %s944_s25 = sadd.s32 4294967294, %s1223_s23   ;;  %s1223_s23 = sphi %s1268_s23, %s18_s23   ;;  %s1219_s22 = sphi %s1266_s22, %s1513_s22   ;;  %s1215_s21 = sphi %s1264_s21, %s1512_s21   ;;  %s1211_s20 = sphi %s1262_s20, %s1511_s20   ;;  %s1207_s19 = sphi %s1260_s19, %s1510_s19   ;;  %s1203_s18 = sphi %s1258_s18, %s1509_s18  }
   0x5   : > { %s30_s26 = sadd.s32 1, %s1219_s22  ;;  %s162_s27 = sadd.s32 1, %s1211_s20 }
   0x6   : > { %p32_p0 = scmp.ge.s32.totalorder %s30_s26, 2  ;;  %p172_p1 = scmp.ne.s32.totalorder %s1211_s20, %s1207_s19 }
   0x7   : > { %p173_p2 = scmp.eq.s32.totalorder %s943_s24, 1  ;;  %p178_p3 = scmp.ne.s32.totalorder %s1207_s19, %s1203_s18 }
   0x8   : > { %s1515_s26 = smov (%p32_p0, %s30_s26), 0  ;;  %p179_p5 = scmp.eq.s32.totalorder %s944_s25, 1 }
   0x9   : > { %p1298_p4 = por %p173_p2, %p172_p1  ;;  %s159_s29 = ssub.s32 %s1219_s22, %s1515_s26 }
   0xa   : > { %p950_p6 = scmp.ge.s32.totalorder %s1223_s23, 1  ;;  %p160_p7 = scmp.eq.s32.totalorder %s159_s29, 0 }
   0xb   : > { %p1305_p8 = por %p179_p5, %p178_p3  ;;  %p233_p9 = scmp.lt.s32.totalorder %s1223_s23, 3 }
   0xc   : > { %s1311_s6 = scalar_select %p160_p7, %s1211_s20, %s162_s27  }
   0xd   : > { %p234_p10 = pnand %p950_p6, %p233_p9 }
   0xe   : > { %v1101_v0 = vld [vmem:[%s1502_s1 + $0x4] ss:$16 sps:$4 sm:$0xff] (!%p234_p10)   ;;  %p274_p11 = scmp.lt.s32.totalorder (!%p234_p10), %s1215_s21, 1  ;;  %v1103_v1 = vld [vmem:[%s1502_s1 + $0xc] ss:$16 sps:$4 sm:$0xff] (!%p234_p10)   ;;  %v1225_v2 = vmov (!%p234_p10), 0   ;;  %v314_v44 = vlaneseq (!%p234_p10) }
   0xf   : > { %237 = sbr.rel (%p234_p10) target bundleno = 492 (0x1ec), region = 40  ;;  %410 = vmatprep.mubr.bf16.mxu0 (!%p234_p10), %v1225_v2  ;;  %451 = vmatprep.mubr.bf16.mxu1 (!%p234_p10), %v1225_v2  ;;  %vm300_vm0 = vcmask (!%p234_p10), 261120   ;;  %v1105_v3 = vld [vmem:[%s1502_s1] ss:$16 sps:$4 sm:$0xff] (!%p234_p10)   ;;  %v1106_v4 = vld [vmem:[%s1502_s1 + $0x8] ss:$16 sps:$4 sm:$0xff] (!%p234_p10)  }
  0x10   : > { %378 = vmatprep.subr.bf16.mxu0 (!%p234_p10), %v1101_v0  ;;  %v1226_v5 = vmov (!%p234_p10), 0.0   ;;  %419 = vmatprep.subr.bf16.mxu1 (!%p234_p10), %v1103_v1  ;;  %v1107_v6 = vld [vmem:[%s1502_s1 + $0x24] ss:$16 sps:$4 sm:$0xff] (!%p234_p10)   ;;  %v1109_v7 = vld [vmem:[%s1502_s1 + $0x2c] ss:$16 sps:$4 sm:$0xff] (!%p234_p10)   ;;  %v315_v45 = vshrl.u32 (!%p234_p10), %v314_v44, 7 }
  0x11   : > { %301 = vst.msk [vmem:[#allocation2] sm:$0xff] (!%p234_p10), %vm300_vm0, %v1226_v5  ;;  %379 = vmatpush1.bf16.msra.mxu0 (!%p234_p10), %v1105_v3  ;;  %420 = vmatpush1.bf16.msra.mxu1 (!%p234_p10), %v1106_v4  ;;  %v1111_v8 = vld [vmem:[%s1502_s1 + $0x20] ss:$16 sps:$4 sm:$0xff] (!%p234_p10)   ;;  %v1112_v9 = vld [vmem:[%s1502_s1 + $0x28] ss:$16 sps:$4 sm:$0xff] (!%p234_p10)   ;;  %s271_s25 = sand.u32 (!%p234_p10), 1, %s1207_s19  }
  0x12   : > { %380 = vmatprep.subr.bf16.mxu0 (!%p234_p10), %v1107_v6  ;;  %421 = vmatprep.subr.bf16.mxu1 (!%p234_p10), %v1109_v7  ;;  %v1113_v11 = vld [vmem:[%s1504_s3 + $0x40] sm:$0xff] (!%p234_p10)   ;;  %v1117_v16 = vld [vmem:[%s1504_s3 + $0x48] sm:$0xff] (!%p234_p10)   ;;  %v1121_v20 = vld [vmem:[%s1504_s3 + $0x50] sm:$0xff] (!%p234_p10)   ;;  %v316_v46 = vsub.s32 (!%p234_p10), 0, %v315_v45  ;;  %v324_v47 = vsub.s32 (!%p234_p10), 2, %v315_v45  ;;  %v320_v49 = vsub.s32 (!%p234_p10), 1, %v315_v45 }
  0x13   : > { %v1114_v13 = vld [vmem:[%s1504_s3 + $0xc0] sm:$0xff] (!%p234_p10)   ;;  %v1118_v17 = vld [vmem:[%s1504_s3 + $0xc8] sm:$0xff] (!%p234_p10)   ;;  %v1122_v21 = vld [vmem:[%s1504_s3 + $0xd0] sm:$0xff] (!%p234_p10)   ;;  %v328_v50 = vsub.s32 (!%p234_p10), 3, %v315_v45  ;;  %s951_s27 = sshll.u32 (!%p234_p10), %s271_s25, 3  ;;  %s997_s8 = sshll.u32 (!%p234_p10), %s1215_s21, 7 }
  0x14   : > { %v1115_v14 = vld [vmem:[%s1504_s3] sm:$0xff] (!%p234_p10)   ;;  %v1119_v18 = vld [vmem:[%s1504_s3 + $0x8] sm:$0xff] (!%p234_p10)   ;;  %v1123_v22 = vld [vmem:[%s1504_s3 + $0x10] sm:$0xff] (!%p234_p10)   ;;  %s273_s9 = scalar_lea.vmem (!%p234_p10), [#allocation3], %s951_s27  ;;  %s1453_s13 = scalar_lea.hbm (!%p234_p10), %s1506_s5, %s997_s8 }
  0x15   : > { %381 = vmatpush1.bf16.msra.mxu0 (!%p234_p10), %v1111_v8  ;;  %422 = vmatpush1.bf16.msra.mxu1 (!%p234_p10), %v1112_v9  ;;  %v1116_v15 = vld [vmem:[%s1504_s3 + $0x80] sm:$0xff] (!%p234_p10)   ;;  %v1120_v19 = vld [vmem:[%s1504_s3 + $0x88] sm:$0xff] (!%p234_p10)   ;;  %v1124_v23 = vld [vmem:[%s1504_s3 + $0x90] sm:$0xff] (!%p234_p10)   ;;  %s834_s10 = sshll.u32 (!%p234_p10), %s273_s9, 4  ;;  %s821_s14 = scalar_lea.sflag (!%p234_p10), [#allocation4], %s271_s25  ;;  %s1455_s10 = int_to_ptr.vmem [resolvable:$true] %s834_s10 }
  0x16   : > { %s275_s15 = scalar_select %p274_p11, %s1215_s21, 1  ;;  %1000 = vmatprep.subr.bf16.mxu0 %v1113_v11  ;;  %1022 = vmatprep.subr.bf16.mxu1 %v1114_v13  ;;  %v1125_v24 = vld [vmem:[%s1504_s3 + $0x58] sm:$0xff]   ;;  %v1129_v28 = vld [vmem:[%s1504_s3 + $0x60] sm:$0xff]   ;;  %v1133_v32 = vld [vmem:[%s1504_s3 + $0x68] sm:$0xff]  }
  0x17   : > { %v1126_v25 = vld [vmem:[%s1504_s3 + $0xd8] sm:$0xff]   ;;  %v1130_v29 = vld [vmem:[%s1504_s3 + $0xe0] sm:$0xff]   ;;  %v1134_v33 = vld [vmem:[%s1504_s3 + $0xe8] sm:$0xff]   ;;  %s1145_s16 = scalar_lea.vmem %s1455_s10, 128  ;;  %s1227_s21 = smov [#allocation3]  }
  0x18   : > { %s952_s7 = sshll.u32 %s275_s15, 3  ;;  %v1127_v26 = vld [vmem:[%s1504_s3 + $0x18] sm:$0xff]   ;;  %v1131_v30 = vld [vmem:[%s1504_s3 + $0x20] sm:$0xff]   ;;  %v1135_v34 = vld [vmem:[%s1504_s3 + $0x28] sm:$0xff]   ;;  %p1146_p12 = scmp.ne.s32.totalorder %s1455_s10, %s1145_s16 }
  0x19   : > { %s277_s12 = scalar_lea.vmem %s1501_s0, %s952_s7  ;;  %v1128_v27 = vld [vmem:[%s1504_s3 + $0x98] sm:$0xff]   ;;  %v1132_v31 = vld [vmem:[%s1504_s3 + $0xa0] sm:$0xff]   ;;  %v1136_v35 = vld [vmem:[%s1504_s3 + $0xa8] sm:$0xff]   ;;  %s1149_s17 = sshll.u32 %s1227_s21, 4  ;;  %s1150_s17 = int_to_ptr.vmem [resolvable:$false] %s1149_s17 }
  0x1a   : > { %v302_v10 = vld [vmem:[%s277_s12] sm:$0xff]  ;;  %v1137_v36 = vld [vmem:[%s1504_s3 + $0x70] sm:$0xff]   ;;  %v1141_v40 = vld [vmem:[%s1504_s3 + $0x78] sm:$0xff]   ;;  %p1147_p13 = pnand %p1146_p12, %p1298_p4  ;;  %s1151_s15 = scalar_lea.vmem %s1150_s17, 256 }
  0x1b   : > { %v303_v12 = vpack.c.bf16 %v302_v10, %v302_v10  ;;  %v1138_v37 = vld [vmem:[%s1504_s3 + $0xf0] sm:$0xff]   ;;  %v1142_v41 = vld [vmem:[%s1504_s3 + $0xf8] sm:$0xff]   ;;  %v312_v48 = vld [vmem:[%s1503_s2] sm:$0xf]  ;;  %p1152_p1 = scmp.lt.s32.totalorder %s1455_s10, %s1150_s17  ;;  %p1153_p2 = scmp.lt.s32.totalorder %s1151_s15, %s1145_s16 }
  0x1c   : > { %v1139_v38 = vld [vmem:[%s1504_s3 + $0x30] sm:$0xff]   ;;  %v1143_v42 = vld [vmem:[%s1504_s3 + $0x38] sm:$0xff]   ;;  %v317_v51 = vrot.slane %v312_v48, %v316_v46  ;;  %v325_v52 = vrot.slane %v312_v48, %v324_v47  ;;  %v321_v53 = vrot.slane %v312_v48, %v320_v49  ;;  %v329_v54 = vrot.slane %v312_v48, %v328_v50  ;;  %p1148_p0 = pneg %p1147_p13 }
  0x1d   : > { %961 = vmatmul.mubr.msk.bf16.vlgmr.msra.gmra.mrb[0].mxu0 %vm300_vm0, %v303_v12  ;;  %962 = vmatmul.mubr.msk.bf16.vlgmr.msra.gmra.mrb[0].mxu1 %vm300_vm0, %v303_v12  ;;  %v1140_v39 = vld [vmem:[%s1504_s3 + $0xb0] sm:$0xff]   ;;  %v1144_v43 = vld [vmem:[%s1504_s3 + $0xb8] sm:$0xff]   ;;  %p1154_p3 = por %p1153_p2, %p1152_p1 }
  0x1e   : > { %1001 = vmatpush3.bf16.msra.mxu0 %v1115_v14  ;;  %1023 = vmatpush3.bf16.msra.mxu1 %v1116_v15 }
  0x1f   : > { %1002 = vmatprep.subr.bf16.mxu0 %v1117_v16  ;;  %1024 = vmatprep.subr.bf16.mxu1 %v1118_v17  ;;  %p1155_p5 = pnand %p1154_p3, %p1148_p0 }
  0x22   : > { %1003 = vmatpush3.bf16.msra.mxu0 %v1119_v18  ;;  %1025 = vmatpush3.bf16.msra.mxu1 %v1120_v19  ;;  %v464_v19 = vld [vmem:[#allocation2] sm:$0xff] }
  0x23   : > { %1004 = vmatprep.subr.bf16.mxu0 %v1121_v20  ;;  %1026 = vmatprep.subr.bf16.mxu1 %v1122_v21 }
  0x26   : > { %1005 = vmatpush3.bf16.msra.mxu0 %v1123_v22  ;;  %1027 = vmatpush3.bf16.msra.mxu1 %v1124_v23 }
  0x27   : > { %1006 = vmatprep.subr.bf16.mxu0 %v1125_v24  ;;  %1028 = vmatprep.subr.bf16.mxu1 %v1126_v25  ;;  %v995_v24 = vld [vmem:[%s1505_s4] ss:$0 sm:$0xff] }
  0x2a   : > { %1007 = vmatpush3.bf16.msra.mxu0 %v1127_v26  ;;  %1029 = vmatpush3.bf16.msra.mxu1 %v1128_v27 }
  0x2b   : > { %1008 = vmatprep.subr.bf16.mxu0 %v1129_v28  ;;  %1030 = vmatprep.subr.bf16.mxu1 %v1130_v29 }
  0x2e   : > { %1009 = vmatpush3.bf16.msra.mxu0 %v1131_v30  ;;  %1031 = vmatpush3.bf16.msra.mxu1 %v1132_v31 }
  0x2f   : > { %1010 = vmatprep.subr.bf16.mxu0 %v1133_v32  ;;  %1032 = vmatprep.subr.bf16.mxu1 %v1134_v33 }
  0x32   : > { %1011 = vmatpush3.bf16.msra.mxu0 %v1135_v34  ;;  %1033 = vmatpush3.bf16.msra.mxu1 %v1136_v35 }
  0x33   : > { %1012 = vmatprep.subr.bf16.mxu0 %v1137_v36  ;;  %1034 = vmatprep.subr.bf16.mxu1 %v1138_v37 }
  0x36   : > { %1013 = vmatpush3.bf16.msra.mxu0 %v1139_v38  ;;  %1035 = vmatpush3.bf16.msra.mxu1 %v1140_v39 }
  0x37   : > { %1014 = vmatprep.subr.bf16.mxu0 %v1141_v40  ;;  %1036 = vmatprep.subr.bf16.mxu1 %v1142_v41 }
  0x3a   : > { %1015 = vmatpush3.bf16.msra.mxu0 %v1143_v42  ;;  %1037 = vmatpush3.bf16.msra.mxu1 %v1144_v43 }
  0xf0   : > { %v412_v55 = vpop.f32.mrb[0].mxu0  ;;  %v453_v56 = vpop.f32.mrb[0].mxu1 }
  0xf1   : > { %v413_v57 = vadd.f32 %v412_v55, %v317_v51  ;;  %v454_v58 = vadd.f32 %v453_v56, %v325_v52  ;;  %v414_v59 = vpop.f32.mrb[1].mxu0  ;;  %v455_v60 = vpop.f32.mrb[1].mxu1 }
  0xf2   : > { %v415_v61 = vadd.f32 %v414_v59, %v321_v53  ;;  %v456_v62 = vadd.f32 %v455_v60, %v329_v54  ;;  %v416_v63 = vpop.f32.mrb[2].mxu0  ;;  %v457_v0 = vpop.f32.mrb[2].mxu1 }
  0xf3   : > { %v460_v1 = vmax.f32 %v413_v57, 0.0  ;;  %v462_v2 = vmax.f32 %v454_v58, 0.0  ;;  %v417_v3 = vpop.f32.mrb[3].mxu0  ;;  %v458_v4 = vpop.f32.mrb[3].mxu1 }
  0xf4   : > { %v461_v5 = vmax.f32 %v415_v61, 0.0  ;;  %v463_v6 = vmax.f32 %v456_v62, 0.0 }
  0xf5   : > { %v465_v9 = vpack.c.bf16 %v460_v1, %v460_v1  ;;  %v467_v10 = vpack.c.bf16 %v462_v2, %v462_v2 }
  0xf6   : > { %v466_v7 = vpack.c.bf16 %v461_v5, %v461_v5  ;;  %v468_v8 = vpack.c.bf16 %v463_v6, %v463_v6 }
  0xf8   : > { %757 = vmatprep.mubr.bf16.mxu0 %v466_v7  ;;  %797 = vmatprep.mubr.bf16.mxu1 %v468_v8 }
  0xf9   : > { %758 = vmatmul.mubr.bf16.vlgmr.msra.gmra.mrb[4].mxu0 %v465_v9  ;;  %798 = vmatmul.mubr.bf16.vlgmr.msra.gmra.mrb[4].mxu1 %v467_v10 }
 0x1cc   : > { %v1016_v11 = vpop.f32.mrb[4].mxu0  ;;  %v1038_v12 = vpop.f32.mrb[4].mxu1 }
 0x1cd   : > { %v1017_v13 = vpop.f32.mrb[5].mxu0  ;;  %v1039_v14 = vpop.f32.mrb[5].mxu1 }
 0x1ce   : > { %v1018_v15 = vadd.f32 %v1017_v13, %v1016_v11  ;;  %v1040_v16 = vadd.f32 %v1039_v14, %v1038_v12  ;;  %v1019_v17 = vpop.f32.mrb[6].mxu0  ;;  %v1041_v18 = vpop.f32.mrb[6].mxu1 }
 0x1cf   : > { %v1020_v20 = vpop.f32.mrb[7].mxu0  ;;  %v1042_v21 = vpop.f32.mrb[7].mxu1 }
 0x1d0   : > { %v800_v22 = vadd.f32 %v1040_v16, %v1018_v15 }
 0x1d2   : > { %v805_v23 = vadd.f32 %v800_v22, %v464_v19 }
 0x1d4   : > { %806 = vst.msk [vmem:[#allocation2] sm:$0xff] %vm300_vm0, %v805_v23 }
 0x1db   : > { %v810_v25 = vld [vmem:[#allocation2] sm:$0xff] }
 0x1dc   : > { %v818_v26 = vadd.f32 %v995_v24, %v810_v25 }
 0x1de   : > { %819 = vst.msk [vmem:[%s273_s9] sm:$0xff] %vm300_vm0, %v818_v26 }
 0x1df   : > { %1158 = shalt.err (!%p1155_p5)
}
 0x1e0   : > { %s1159_s24 = scalar_lea.hbm %s1453_s13, 128  ;;  %s1163_s29 = scalar_lea.hbm %s1506_s5, 256 }
 0x1e1   : > { %p1160_p6 = scmp.ne.s32.totalorder %s1453_s13, %s1159_s24  ;;  %p1164_p10 = scmp.lt.u32.totalorder %s1453_s13, %s1506_s5 }
 0x1e2   : > { %p1165_p11 = scmp.lt.u32.totalorder %s1163_s29, %s1159_s24  ;;  %p1167_p13 = scmp.lt.u32.totalorder %s1159_s24, %s1453_s13 }
 0x1e3   : > { %p1161_p7 = pnand %p1160_p6, %p1298_p4 }
 0x1e4   : > { %p1166_p12 = por %p1165_p11, %p1164_p10 }
 0x1e5   : > { %p1162_p9 = pneg %p1161_p7 }
 0x1e6   : > { %p1168_p0 = por %p1167_p13, %p1166_p12 }
 0x1e8   : > { %p1169_p1 = pnand %p1168_p0, %p1162_p9 }
 0x1ea   : > { %1172 = shalt.err (!%p1169_p1)
}
 0x1eb   : > { %1044 = dma.vmem_to_hbm [thread:$0]  (%p1298_p4), %s1455_s10, 128, %s1453_s13, %s821_s14  }
 0x1ec PF: > { %p1050_p2 = scmp.ge.s32.totalorder %s1223_s23, 2  ;;  %s846_s9 = sand.u32 1, %s1203_s18  }
 0x1ed   : > { %s847_s11 = scalar_lea.sflag [#allocation4], %s846_s9 }
 0x1ee   : > { %p1047_p3 = pnand %p1050_p2, %p1305_p8 }
 0x1f0   : > { %1198 = dma.done.wait (!%p1047_p3), %s847_s11, 128  }
 0x1f1   : > { %1200 = vsyncadd (!%p1047_p3), %s847_s11, 4294967168  ;;  %s18_s23 = sadd.s32 1, %s1223_s23   ;;  %s1509_s18 = smov %s1207_s19 }
 0x1f2   : > { %p15_p5 = scmp.ge.s32.totalorder %s18_s23, 4   ;;  %s1510_s19 = smov %s1211_s20 }
 0x1f3   : > { %s1511_s20 = smov %s1311_s6  ;;  %s1512_s21 = smov %s1219_s22 }
 0x1f4   : > { %s1513_s22 = smov %s1515_s26  ;;  %17 = sbr.rel (!%p15_p5) target bundleno = 4 (0x4), region = 92 }
 0x1fb   :  { %852 = vsyncpa [#allocation4], 1 }
 0x1fc   :  { %854 = vsyncpa [#allocation4 + $0x1], 1 }

</bundles_post_ra>
